<compile_context>
chip_gen: v6e
topology: v6e:2x2x1
jax: 0.10.0
libtpu: 0.0.40
codegen_flags: <defaults>
</compile_context>

<pallas_src>
import functools
import math

import jax
import jax.numpy as jnp
from jax import lax
from jax.experimental import pallas as pl
from jax.experimental.pallas import tpu as pltpu


_LANE = 128


def _vmem_limit_bytes():
    # v5e/v6e: 128 MiB physical VMEM -> raise the default scoped limit.
    # v7x: 64 MiB physical -> cap with headroom instead of raising past it.
    try:
        cap = int(pltpu.get_tpu_info().vmem_capacity_bytes)
    except Exception:
        cap = 64 * 1024 * 1024
    return min(cap - 8 * 1024 * 1024, 120 * 1024 * 1024)


def _pick_q_tile(s):
    # 256 matches the 256-wide MXU on v6e/v7x; 128 suits v5e.
    # TODO(synk): re-sweep tile size per generation (v7x has half the VMEM).
    for t in (256, 128):
        if s % t == 0:
            return t
    return s  # small / ragged sequences: a single query tile


def _process_attention_kernel(
    heads, dim_head,
    x_q_ref,   # (1, tq, dim)     bf16 query-tile input block
    x_kv_ref,  # (1, S,  dim)     bf16 full-sequence input block (for K/V)
    wq_ref,    # (dim, E)         bf16 fused + softmax-scaled Q weight
    bq_ref,    # (1, E)           f32  fused + scaled Q bias
    wkv_ref,   # (dim, 2E)        bf16 fused K|V weight
    bkv_ref,   # (1, 2E)          f32  fused K|V bias
    wo_ref,    # (E, dim_pad)     bf16 fused (out_proj @ to_out) weight
    bo_ref,    # (1, dim_pad)     f32  fused output bias
    o_ref,     # (1, tq, dim_pad) f32  output block
    kv_sc,     # (S, 2E)          bf16 VMEM scratch: cached K|V for current b
    ctx_sc,    # (tq, E)          bf16 VMEM scratch: lane-packed head contexts
):
    E = heads * dim_head

    # (1) K/V projection once per batch element.  The query-tile axis is the
    # innermost ("arbitrary") grid axis, so qi == 0 runs first for every b and
    # the cached scratch is reused by the remaining query tiles of that batch.
    @pl.when(pl.program_id(1) == 0)
    def _():
        kv = jnp.dot(x_kv_ref[0], wkv_ref[...],
                     preferred_element_type=jnp.float32) + bkv_ref[...]
        kv_sc[...] = kv.astype(jnp.bfloat16)

    # (2) Head-batched Q projection for this query tile: one lane-dense
    # (tq, dim) @ (dim, E) matmul instead of H matmuls with N = dh.
    q = (jnp.dot(x_q_ref[0], wq_ref[...], preferred_element_type=jnp.float32)
         + bq_ref[...]).astype(jnp.bfloat16)                        # (tq, E)

    # (3) Per-head attention using static lane slices at offset h*dh.
    # TODO(synk): for H >= 8 / long S switch to lax.fori_loop + a KV grid axis
    # with online softmax to bound live ranges and the (tq, S) score tile.
    for h in range(heads):  # static unroll; heads is a small static int
        lo = h * dim_head
        q_h = q[:, lo:lo + dim_head]                                # (tq, dh)
        k_h = kv_sc[:, lo:lo + dim_head]                            # (S, dh)
        v_h = kv_sc[:, E + lo:E + lo + dim_head]                    # (S, dh)

        # scores = q_h @ k_h^T via dot_general contracting dh (no transpose);
        # 1/sqrt(dh) is already folded into wq/bq.
        s = lax.dot_general(q_h, k_h, (((1,), (1,)), ((), ())),
                            preferred_element_type=jnp.float32)     # (tq, S)
        m = jnp.max(s, axis=-1, keepdims=True)
        p = jnp.exp(s - m)                                          # un-normalized
        l = jnp.sum(p, axis=-1, keepdims=True)

        ctx = jnp.dot(p.astype(jnp.bfloat16), v_h,
                      preferred_element_type=jnp.float32)           # (tq, dh)
        # Deferred softmax normalization: scale the (tq, dh) context, not the
        # (tq, S) probabilities; exact reciprocal in f32 for tighter parity.
        ctx = ctx * pl.reciprocal(l, approx=False)
        ctx_sc[:, lo:lo + dim_head] = ctx.astype(jnp.bfloat16)

    # (4) Single full-depth (K = E) output projection replaces the per-head
    # accumulation: head concat + out_proj + to_out in one lane-dense matmul.
    out = jnp.dot(ctx_sc[...], wo_ref[...],
                  preferred_element_type=jnp.float32) + bo_ref[...]
    o_ref[0] = out.astype(o_ref.dtype)


def prepare_params(params, *, heads, dim_head):
    """One-time host-side fusion / packing / bf16 cast of the module weights."""
    (wq, wk, wv, wiq, wik, wiv, biq, bik, biv, wop, bop, wto, bto) = params
    dim = wq.shape[0]
    dim_pad = ((dim + _LANE - 1) // _LANE) * _LANE  # == dim when dim % 128 == 0
    scale = 1.0 / math.sqrt(dim_head)

    # Fuse the back-to-back linears (no nonlinearity between them).
    wq_f = (wq @ wiq) * scale                  # (dim, E), softmax scale folded in
    bq_f = biq * scale                         # (1, E)
    wkv_f = jnp.concatenate([wk @ wik, wv @ wiv], axis=1)   # (dim, 2E)
    bkv_f = jnp.concatenate([bik, biv], axis=1)             # (1, 2E)
    wo_f = jnp.pad(wop @ wto, ((0, 0), (0, dim_pad - dim))) # (E, dim_pad)
    bo_f = jnp.pad(bop @ wto + bto, ((0, 0), (0, dim_pad - dim)))

    return (wq_f.astype(jnp.bfloat16), bq_f.astype(jnp.float32),
            wkv_f.astype(jnp.bfloat16), bkv_f.astype(jnp.float32),
            wo_f.astype(jnp.bfloat16), bo_f.astype(jnp.float32))


def process_attention(x, fused_params, *, heads, dim_head):
    B, S, dim = x.shape
    wq, bq, wkv, bkv, wo, bo = fused_params
    E = heads * dim_head
    dim_pad = wo.shape[-1]

    tq = _pick_q_tile(S)
    num_q = S // tq

    x_bf = x.astype(jnp.bfloat16)  # halve input DMA bytes; MXU feed is bf16

    def const_spec(arr):
        ndim = arr.ndim

        def idx(b, qi):
            return (0,) * ndim  # constant index map -> weights stay resident
        # TODO(synk): pipeline_mode=pl.Buffered(1) here once single-buffering
        # of constant blocks is supported end-to-end (halves weight VMEM,
        # matters most under v7x's 64 MiB VMEM).
        return pl.BlockSpec(arr.shape, idx)

    kernel = functools.partial(_process_attention_kernel, heads, dim_head)

    out_padded = pl.pallas_call(
        kernel,
        out_shape=jax.ShapeDtypeStruct((B, S, dim_pad), jnp.float32),
        grid_spec=pltpu.PrefetchScalarGridSpec(
            num_scalar_prefetch=0,
            grid=(B, num_q),
            in_specs=[
                pl.BlockSpec((1, tq, dim), lambda b, qi: (b, qi, 0)),  # x (Q tile)
                pl.BlockSpec((1, S, dim), lambda b, qi: (b, 0, 0)),    # x (K/V)
                const_spec(wq), const_spec(bq),
                const_spec(wkv), const_spec(bkv),
                const_spec(wo), const_spec(bo),
            ],
            out_specs=pl.BlockSpec((1, tq, dim_pad), lambda b, qi: (b, qi, 0)),
            scratch_shapes=[
                pltpu.VMEM((S, 2 * E), jnp.bfloat16),   # cached K|V per batch
                pltpu.VMEM((tq, E), jnp.bfloat16),      # lane-packed contexts
            ],
        ),
        compiler_params=pltpu.CompilerParams(
            # batch: parallel (megacore); query tiles: arbitrary (carry the
            # cached K/V scratch across them for each batch element).
            dimension_semantics=("parallel", "arbitrary"),
            vmem_limit_bytes=_vmem_limit_bytes(),
        ),
    )(x_bf, x_bf, wq, bq, wkv, bkv, wo, bo)

    # No extra pass when dim is already lane-aligned; output stays f32 to
    # match the PyTorch module's dtype.
    out = out_padded if dim_pad == dim else out_padded[..., :dim]
    return out.astype(x.dtype)


def reference_forward(x, params, *, heads, dim_head):
    """Pure-JAX f32 reference mirroring the PyTorch forward (unfused)."""
    (wq, wk, wv, wiq, wik, wiv, biq, bik, biv, wop, bop, wto, bto) = params
    B, S, dim = x.shape
    E = heads * dim_head

    q = x @ wq
    k = x @ wk
    v = x @ wv

    qp = q @ wiq + biq
    kp = k @ wik + bik
    vp = v @ wiv + biv

    def split(t):  # (B, S, E) -> (B, H, S, dh)
        return t.reshape(B, S, heads, dim_head).transpose(0, 2, 1, 3)

    qh, kh, vh = split(qp), split(kp), split(vp)
    scores = jnp.einsum("bhqd,bhkd->bhqk", qh, kh) / math.sqrt(dim_head)
    p = jax.nn.softmax(scores, axis=-1)
    oh = jnp.einsum("bhqk,bhkd->bhqd", p, vh)
    concat = oh.transpose(0, 2, 1, 3).reshape(B, S, E)
    attn_out = concat @ wop + bop
    return attn_out @ wto + bto


if __name__ == "__main__":
    # Small smoke-test shapes; tile/buffer decisions are tuned for production
    # shapes (S multiples of 128/256, dh >= 64) — see comments above.
    B, S = 2, 8
    dim = 32
    heads = 4
    dim_head = 8
    E = heads * dim_head  # inner_dim = 32

    key = jax.random.PRNGKey(0)
    keys = jax.random.split(key, 14)

    def init(k, shape, scale=0.05):
        return jax.random.normal(k, shape, dtype=jnp.float32) * scale

    x = jax.random.normal(keys[0], (B, S, dim), dtype=jnp.float32)

    # Weights stored pre-transposed (in_features, out_features); biases (1, out).
    wq = init(keys[1], (dim, E))
    wk = init(keys[2], (dim, E))
    wv = init(keys[3], (dim, E))
    wiq = init(keys[4], (E, E))
    wik = init(keys[5], (E, E))
    wiv = init(keys[6], (E, E))
    biq = init(keys[7], (1, E))
    bik = init(keys[8], (1, E))
    biv = init(keys[9], (1, E))
    wop = init(keys[10], (E, E))
    bop = init(keys[11], (1, E))
    wto = init(keys[12], (E, dim))
    bto = init(keys[13], (1, dim))

    params = (wq, wk, wv, wiq, wik, wiv, biq, bik, biv, wop, bop, wto, bto)

    fused = prepare_params(params, heads=heads, dim_head=dim_head)

    out = jax.block_until_ready(
        process_attention(x, fused, heads=heads, dim_head=dim_head))
    ref = jax.block_until_ready(
        reference_forward(x, params, heads=heads, dim_head=dim_head))

    assert out.shape == (B, S, dim)
    max_diff = float(jnp.max(jnp.abs(out - ref)))
    # bf16 MXU feeds + host-side weight fusion change rounding slightly vs.
    # the unfused f32 reference; tolerance reflects that (not a kernel bug).
    assert jnp.allclose(out, ref, atol=5e-3, rtol=5e-3), f"max abs diff {max_diff}"

    print("KERNEL_OK")
</pallas_src>

<mosaic_0001>
module attributes {stable_mosaic.version = 11 : i64} {
  func.func @_process_attention_kernel(%arg0: i32, %arg1: i32, %arg2: memref<1x8x32xbf16, #tpu.memory_space<vmem>>, %arg3: memref<1x8x32xbf16, #tpu.memory_space<vmem>>, %arg4: memref<32x32xbf16, #tpu.memory_space<vmem>>, %arg5: memref<1x32xf32, #tpu.memory_space<vmem>>, %arg6: memref<32x64xbf16, #tpu.memory_space<vmem>>, %arg7: memref<1x64xf32, #tpu.memory_space<vmem>>, %arg8: memref<32x128xbf16, #tpu.memory_space<vmem>>, %arg9: memref<1x128xf32, #tpu.memory_space<vmem>>, %arg10: memref<1x8x128xf32, #tpu.memory_space<vmem>>, %arg11: memref<8x64xbf16, #tpu.memory_space<vmem>>, %arg12: memref<8x32xbf16, #tpu.memory_space<vmem>>) attributes {dimension_semantics = [#tpu.dimension_semantics<parallel>, #tpu.dimension_semantics<arbitrary>], iteration_bounds = array<i64: 2, 1>, scalar_prefetch = 0 : i64, scratch_operands = 2 : i64, tpu.core_type = #tpu.core_type<tc>, window_params = [{transform_indices = @transform_0, window_bounds = array<i64: 1, 8, 32>}, {transform_indices = @transform_1, window_bounds = array<i64: 1, 8, 32>}, {pipeline_mode = #tpu.pipeline_mode<synchronous>, transform_indices = @transform_2, window_bounds = array<i64: 32, 32>}, {pipeline_mode = #tpu.pipeline_mode<synchronous>, transform_indices = @transform_3, window_bounds = array<i64: 1, 32>}, {pipeline_mode = #tpu.pipeline_mode<synchronous>, transform_indices = @transform_4, window_bounds = array<i64: 32, 64>}, {pipeline_mode = #tpu.pipeline_mode<synchronous>, transform_indices = @transform_5, window_bounds = array<i64: 1, 64>}, {pipeline_mode = #tpu.pipeline_mode<synchronous>, transform_indices = @transform_6, window_bounds = array<i64: 32, 128>}, {pipeline_mode = #tpu.pipeline_mode<synchronous>, transform_indices = @transform_7, window_bounds = array<i64: 1, 128>}, {transform_indices = @transform_8, window_bounds = array<i64: 1, 8, 128>}]} {
    %c0_i32 = arith.constant 0 : i32
    %0 = arith.cmpi eq, %arg1, %c0_i32 : i32
    %1 = arith.extui %0 : i1 to i32
    %c0_i32_0 = arith.constant 0 : i32
    %2 = arith.cmpi ne, %1, %c0_i32_0 : i32
    scf.if %2 {
      %c0_50 = arith.constant 0 : index
      %c0_51 = arith.constant 0 : index
      %c0_52 = arith.constant 0 : index
      %92 = vector.load %arg3[%c0_50, %c0_51, %c0_52] : memref<1x8x32xbf16, #tpu.memory_space<vmem>>, vector<1x8x32xbf16>
      %93 = vector.shape_cast %92 : vector<1x8x32xbf16> to vector<8x32xbf16>
      %c0_53 = arith.constant 0 : index
      %c0_54 = arith.constant 0 : index
      %94 = vector.load %arg6[%c0_53, %c0_54] : memref<32x64xbf16, #tpu.memory_space<vmem>>, vector<32x64xbf16>
      %cst_55 = arith.constant dense<0.000000e+00> : vector<8x64xf32>
      %95 = tpu.matmul %93, %94, %cst_55 {dimension_numbers = #tpu.dot_dimension_numbers<[1], [0], [0], [1], [0, 0, 1, 1], [], []>} : vector<8x32xbf16>, vector<32x64xbf16>, vector<8x64xf32> -> vector<8x64xf32>
      %c0_56 = arith.constant 0 : index
      %c0_57 = arith.constant 0 : index
      %96 = vector.load %arg7[%c0_56, %c0_57] : memref<1x64xf32, #tpu.memory_space<vmem>>, vector<1x64xf32>
      %97 = vector.broadcast %96 : vector<1x64xf32> to vector<8x64xf32>
      %98 = arith.addf %95, %97 : vector<8x64xf32>
      %99 = arith.truncf %98 : vector<8x64xf32> to vector<8x64xbf16>
      %c0_58 = arith.constant 0 : index
      %c0_59 = arith.constant 0 : index
      %100 = vector.load %arg11[%c0_58, %c0_59] : memref<8x64xbf16, #tpu.memory_space<vmem>>, vector<8x64xbf16>
      tpu.vector_store %arg11[%c0_58, %c0_59], %99 {strides = array<i32>} : memref<8x64xbf16, #tpu.memory_space<vmem>>, vector<8x64xbf16>,
    } else {
    }
    %c0 = arith.constant 0 : index
    %c0_1 = arith.constant 0 : index
    %c0_2 = arith.constant 0 : index
    %3 = vector.load %arg2[%c0, %c0_1, %c0_2] : memref<1x8x32xbf16, #tpu.memory_space<vmem>>, vector<1x8x32xbf16>
    %4 = vector.shape_cast %3 : vector<1x8x32xbf16> to vector<8x32xbf16>
    %c0_3 = arith.constant 0 : index
    %c0_4 = arith.constant 0 : index
    %5 = vector.load %arg4[%c0_3, %c0_4] : memref<32x32xbf16, #tpu.memory_space<vmem>>, vector<32x32xbf16>
    %cst = arith.constant dense<0.000000e+00> : vector<8x32xf32>
    %6 = tpu.matmul %4, %5, %cst {dimension_numbers = #tpu.dot_dimension_numbers<[1], [0], [0], [1], [0, 0, 1, 1], [], []>} : vector<8x32xbf16>, vector<32x32xbf16>, vector<8x32xf32> -> vector<8x32xf32>
    %c0_5 = arith.constant 0 : index
    %c0_6 = arith.constant 0 : index
    %7 = vector.load %arg5[%c0_5, %c0_6] : memref<1x32xf32, #tpu.memory_space<vmem>>, vector<1x32xf32>
    %8 = vector.broadcast %7 : vector<1x32xf32> to vector<8x32xf32>
    %9 = arith.addf %6, %8 : vector<8x32xf32>
    %10 = arith.truncf %9 : vector<8x32xf32> to vector<8x32xbf16>
    %11 = vector.extract_strided_slice %10 {offsets = [0, 0], sizes = [8, 8], strides = [1, 1]} : vector<8x32xbf16> to vector<8x8xbf16>
    %c0_7 = arith.constant 0 : index
    %c0_8 = arith.constant 0 : index
    %12 = vector.load %arg11[%c0_7, %c0_8] : memref<8x64xbf16, #tpu.memory_space<vmem>>, vector<8x8xbf16>
    %c0_9 = arith.constant 0 : index
    %c32 = arith.constant 32 : index
    %13 = vector.load %arg11[%c0_9, %c32] : memref<8x64xbf16, #tpu.memory_space<vmem>>, vector<8x8xbf16>
    %cst_10 = arith.constant dense<0.000000e+00> : vector<8x8xf32>
    %14 = tpu.matmul %11, %12, %cst_10 {dimension_numbers = #tpu.dot_dimension_numbers<[1], [1], [0], [0], [0, 0, 1, 0], [], []>} : vector<8x8xbf16>, vector<8x8xbf16>, vector<8x8xf32> -> vector<8x8xf32>
    %cst_11 = arith.constant dense<0xFF800000> : vector<8xf32>
    %15 = vector.multi_reduction <maximumf>, %14, %cst_11 [1] : vector<8x8xf32> to vector<8xf32>
    %16 = vector.shape_cast %15 : vector<8xf32> to vector<8x1xf32>
    %17 = vector.broadcast %16 : vector<8x1xf32> to vector<8x8xf32>
    %18 = arith.subf %14, %17 : vector<8x8xf32>
    %19 = math.exp %18 : vector<8x8xf32>
    %cst_12 = arith.constant dense<0.000000e+00> : vector<8xf32>
    %20 = vector.multi_reduction <add>, %19, %cst_12 [1] : vector<8x8xf32> to vector<8xf32>
    %21 = vector.shape_cast %20 : vector<8xf32> to vector<8x1xf32>
    %22 = arith.truncf %19 : vector<8x8xf32> to vector<8x8xbf16>
    %cst_13 = arith.constant dense<0.000000e+00> : vector<8x8xf32>
    %23 = tpu.matmul %22, %13, %cst_13 {dimension_numbers = #tpu.dot_dimension_numbers<[1], [0], [0], [1], [0, 0, 1, 1], [], []>} : vector<8x8xbf16>, vector<8x8xbf16>, vector<8x8xf32> -> vector<8x8xf32>
    %24 = tpu.reciprocal %21 : vector<8x1xf32> -> vector<8x1xf32>
    %25 = vector.broadcast %24 : vector<8x1xf32> to vector<8x8xf32>
    %26 = arith.mulf %23, %25 : vector<8x8xf32>
    %27 = arith.truncf %26 : vector<8x8xf32> to vector<8x8xbf16>
    %c0_14 = arith.constant 0 : index
    %c0_15 = arith.constant 0 : index
    %28 = vector.load %arg12[%c0_14, %c0_15] : memref<8x32xbf16, #tpu.memory_space<vmem>>, vector<8x8xbf16>
    tpu.vector_store %arg12[%c0_14, %c0_15], %27 {strides = array<i32>} : memref<8x32xbf16, #tpu.memory_space<vmem>>, vector<8x8xbf16>,
    %29 = vector.extract_strided_slice %10 {offsets = [0, 8], sizes = [8, 8], strides = [1, 1]} : vector<8x32xbf16> to vector<8x8xbf16>
    %c0_16 = arith.constant 0 : index
    %c8 = arith.constant 8 : index
    %30 = vector.load %arg11[%c0_16, %c8] : memref<8x64xbf16, #tpu.memory_space<vmem>>, vector<8x8xbf16>
    %c0_17 = arith.constant 0 : index
    %c40 = arith.constant 40 : index
    %31 = vector.load %arg11[%c0_17, %c40] : memref<8x64xbf16, #tpu.memory_space<vmem>>, vector<8x8xbf16>
    %cst_18 = arith.constant dense<0.000000e+00> : vector<8x8xf32>
    %32 = tpu.matmul %29, %30, %cst_18 {dimension_numbers = #tpu.dot_dimension_numbers<[1], [1], [0], [0], [0, 0, 1, 0], [], []>} : vector<8x8xbf16>, vector<8x8xbf16>, vector<8x8xf32> -> vector<8x8xf32>
    %cst_19 = arith.constant dense<0xFF800000> : vector<8xf32>
    %33 = vector.multi_reduction <maximumf>, %32, %cst_19 [1] : vector<8x8xf32> to vector<8xf32>
    %34 = vector.shape_cast %33 : vector<8xf32> to vector<8x1xf32>
    %35 = vector.broadcast %34 : vector<8x1xf32> to vector<8x8xf32>
    %36 = arith.subf %32, %35 : vector<8x8xf32>
    %37 = math.exp %36 : vector<8x8xf32>
    %cst_20 = arith.constant dense<0.000000e+00> : vector<8xf32>
    %38 = vector.multi_reduction <add>, %37, %cst_20 [1] : vector<8x8xf32> to vector<8xf32>
    %39 = vector.shape_cast %38 : vector<8xf32> to vector<8x1xf32>
    %40 = arith.truncf %37 : vector<8x8xf32> to vector<8x8xbf16>
    %cst_21 = arith.constant dense<0.000000e+00> : vector<8x8xf32>
    %41 = tpu.matmul %40, %31, %cst_21 {dimension_numbers = #tpu.dot_dimension_numbers<[1], [0], [0], [1], [0, 0, 1, 1], [], []>} : vector<8x8xbf16>, vector<8x8xbf16>, vector<8x8xf32> -> vector<8x8xf32>
    %42 = tpu.reciprocal %39 : vector<8x1xf32> -> vector<8x1xf32>
    %43 = vector.broadcast %42 : vector<8x1xf32> to vector<8x8xf32>
    %44 = arith.mulf %41, %43 : vector<8x8xf32>
    %45 = arith.truncf %44 : vector<8x8xf32> to vector<8x8xbf16>
    %c0_22 = arith.constant 0 : index
    %c8_23 = arith.constant 8 : index
    %46 = vector.load %arg12[%c0_22, %c8_23] : memref<8x32xbf16, #tpu.memory_space<vmem>>, vector<8x8xbf16>
    tpu.vector_store %arg12[%c0_22, %c8_23], %45 {strides = array<i32>} : memref<8x32xbf16, #tpu.memory_space<vmem>>, vector<8x8xbf16>,
    %47 = vector.extract_strided_slice %10 {offsets = [0, 16], sizes = [8, 8], strides = [1, 1]} : vector<8x32xbf16> to vector<8x8xbf16>
    %c0_24 = arith.constant 0 : index
    %c16 = arith.constant 16 : index
    %48 = vector.load %arg11[%c0_24, %c16] : memref<8x64xbf16, #tpu.memory_space<vmem>>, vector<8x8xbf16>
    %c0_25 = arith.constant 0 : index
    %c48 = arith.constant 48 : index
    %49 = vector.load %arg11[%c0_25, %c48] : memref<8x64xbf16, #tpu.memory_space<vmem>>, vector<8x8xbf16>
    %cst_26 = arith.constant dense<0.000000e+00> : vector<8x8xf32>
    %50 = tpu.matmul %47, %48, %cst_26 {dimension_numbers = #tpu.dot_dimension_numbers<[1], [1], [0], [0], [0, 0, 1, 0], [], []>} : vector<8x8xbf16>, vector<8x8xbf16>, vector<8x8xf32> -> vector<8x8xf32>
    %cst_27 = arith.constant dense<0xFF800000> : vector<8xf32>
    %51 = vector.multi_reduction <maximumf>, %50, %cst_27 [1] : vector<8x8xf32> to vector<8xf32>
    %52 = vector.shape_cast %51 : vector<8xf32> to vector<8x1xf32>
    %53 = vector.broadcast %52 : vector<8x1xf32> to vector<8x8xf32>
    %54 = arith.subf %50, %53 : vector<8x8xf32>
    %55 = math.exp %54 : vector<8x8xf32>
    %cst_28 = arith.constant dense<0.000000e+00> : vector<8xf32>
    %56 = vector.multi_reduction <add>, %55, %cst_28 [1] : vector<8x8xf32> to vector<8xf32>
    %57 = vector.shape_cast %56 : vector<8xf32> to vector<8x1xf32>
    %58 = arith.truncf %55 : vector<8x8xf32> to vector<8x8xbf16>
    %cst_29 = arith.constant dense<0.000000e+00> : vector<8x8xf32>
    %59 = tpu.matmul %58, %49, %cst_29 {dimension_numbers = #tpu.dot_dimension_numbers<[1], [0], [0], [1], [0, 0, 1, 1], [], []>} : vector<8x8xbf16>, vector<8x8xbf16>, vector<8x8xf32> -> vector<8x8xf32>
    %60 = tpu.reciprocal %57 : vector<8x1xf32> -> vector<8x1xf32>
    %61 = vector.broadcast %60 : vector<8x1xf32> to vector<8x8xf32>
    %62 = arith.mulf %59, %61 : vector<8x8xf32>
    %63 = arith.truncf %62 : vector<8x8xf32> to vector<8x8xbf16>
    %c0_30 = arith.constant 0 : index
    %c16_31 = arith.constant 16 : index
    %64 = vector.load %arg12[%c0_30, %c16_31] : memref<8x32xbf16, #tpu.memory_space<vmem>>, vector<8x8xbf16>
    tpu.vector_store %arg12[%c0_30, %c16_31], %63 {strides = array<i32>} : memref<8x32xbf16, #tpu.memory_space<vmem>>, vector<8x8xbf16>,
    %65 = vector.extract_strided_slice %10 {offsets = [0, 24], sizes = [8, 8], strides = [1, 1]} : vector<8x32xbf16> to vector<8x8xbf16>
    %c0_32 = arith.constant 0 : index
    %c24 = arith.constant 24 : index
    %66 = vector.load %arg11[%c0_32, %c24] : memref<8x64xbf16, #tpu.memory_space<vmem>>, vector<8x8xbf16>
    %c0_33 = arith.constant 0 : index
    %c56 = arith.constant 56 : index
    %67 = vector.load %arg11[%c0_33, %c56] : memref<8x64xbf16, #tpu.memory_space<vmem>>, vector<8x8xbf16>
    %cst_34 = arith.constant dense<0.000000e+00> : vector<8x8xf32>
    %68 = tpu.matmul %65, %66, %cst_34 {dimension_numbers = #tpu.dot_dimension_numbers<[1], [1], [0], [0], [0, 0, 1, 0], [], []>} : vector<8x8xbf16>, vector<8x8xbf16>, vector<8x8xf32> -> vector<8x8xf32>
    %cst_35 = arith.constant dense<0xFF800000> : vector<8xf32>
    %69 = vector.multi_reduction <maximumf>, %68, %cst_35 [1] : vector<8x8xf32> to vector<8xf32>
    %70 = vector.shape_cast %69 : vector<8xf32> to vector<8x1xf32>
    %71 = vector.broadcast %70 : vector<8x1xf32> to vector<8x8xf32>
    %72 = arith.subf %68, %71 : vector<8x8xf32>
    %73 = math.exp %72 : vector<8x8xf32>
    %cst_36 = arith.constant dense<0.000000e+00> : vector<8xf32>
    %74 = vector.multi_reduction <add>, %73, %cst_36 [1] : vector<8x8xf32> to vector<8xf32>
    %75 = vector.shape_cast %74 : vector<8xf32> to vector<8x1xf32>
    %76 = arith.truncf %73 : vector<8x8xf32> to vector<8x8xbf16>
    %cst_37 = arith.constant dense<0.000000e+00> : vector<8x8xf32>
    %77 = tpu.matmul %76, %67, %cst_37 {dimension_numbers = #tpu.dot_dimension_numbers<[1], [0], [0], [1], [0, 0, 1, 1], [], []>} : vector<8x8xbf16>, vector<8x8xbf16>, vector<8x8xf32> -> vector<8x8xf32>
    %78 = tpu.reciprocal %75 : vector<8x1xf32> -> vector<8x1xf32>
    %79 = vector.broadcast %78 : vector<8x1xf32> to vector<8x8xf32>
    %80 = arith.mulf %77, %79 : vector<8x8xf32>
    %81 = arith.truncf %80 : vector<8x8xf32> to vector<8x8xbf16>
    %c0_38 = arith.constant 0 : index
    %c24_39 = arith.constant 24 : index
    %82 = vector.load %arg12[%c0_38, %c24_39] : memref<8x32xbf16, #tpu.memory_space<vmem>>, vector<8x8xbf16>
    tpu.vector_store %arg12[%c0_38, %c24_39], %81 {strides = array<i32>} : memref<8x32xbf16, #tpu.memory_space<vmem>>, vector<8x8xbf16>,
    %c0_40 = arith.constant 0 : index
    %c0_41 = arith.constant 0 : index
    %83 = vector.load %arg12[%c0_40, %c0_41] : memref<8x32xbf16, #tpu.memory_space<vmem>>, vector<8x32xbf16>
    %c0_42 = arith.constant 0 : index
    %c0_43 = arith.constant 0 : index
    %84 = vector.load %arg8[%c0_42, %c0_43] : memref<32x128xbf16, #tpu.memory_space<vmem>>, vector<32x128xbf16>
    %cst_44 = arith.constant dense<0.000000e+00> : vector<8x128xf32>
    %85 = tpu.matmul %83, %84, %cst_44 {dimension_numbers = #tpu.dot_dimension_numbers<[1], [0], [0], [1], [0, 0, 1, 1], [], []>} : vector<8x32xbf16>, vector<32x128xbf16>, vector<8x128xf32> -> vector<8x128xf32>
    %c0_45 = arith.constant 0 : index
    %c0_46 = arith.constant 0 : index
    %86 = vector.load %arg9[%c0_45, %c0_46] : memref<1x128xf32, #tpu.memory_space<vmem>>, vector<1x128xf32>
    %87 = vector.broadcast %86 : vector<1x128xf32> to vector<8x128xf32>
    %88 = arith.addf %85, %87 : vector<8x128xf32>
    %c0_47 = arith.constant 0 : index
    %c0_48 = arith.constant 0 : index
    %c0_49 = arith.constant 0 : index
    %89 = vector.load %arg10[%c0_47, %c0_48, %c0_49] : memref<1x8x128xf32, #tpu.memory_space<vmem>>, vector<1x8x128xf32>
    %90 = vector.shape_cast %89 : vector<1x8x128xf32> to vector<8x128xf32>
    %91 = vector.shape_cast %88 : vector<8x128xf32> to vector<1x8x128xf32>
    tpu.vector_store %arg10[%c0_47, %c0_48, %c0_49], %91 {strides = array<i32>} : memref<1x8x128xf32, #tpu.memory_space<vmem>>, vector<1x8x128xf32>,
    return
  }
  func.func @transform_0(%arg0: i32, %arg1: i32) -> (i32, i32, i32) {
    %c0_i32 = arith.constant 0 : i32
    %c0_i32_0 = arith.constant 0 : i32
    return %arg0, %arg1, %c0_i32 : i32, i32, i32
  }
  func.func @transform_1(%arg0: i32, %arg1: i32) -> (i32, i32, i32) {
    %c0_i32 = arith.constant 0 : i32
    %c0_i32_0 = arith.constant 0 : i32
    %c0_i32_1 = arith.constant 0 : i32
    return %arg0, %c0_i32, %c0_i32_0 : i32, i32, i32
  }
  func.func @transform_2(%arg0: i32, %arg1: i32) -> (i32, i32) {
    %c0_i32 = arith.constant 0 : i32
    %c0_i32_0 = arith.constant 0 : i32
    %c0_i32_1 = arith.constant 0 : i32
    return %c0_i32, %c0_i32_0 : i32, i32
  }
  func.func @transform_3(%arg0: i32, %arg1: i32) -> (i32, i32) {
    %c0_i32 = arith.constant 0 : i32
    %c0_i32_0 = arith.constant 0 : i32
    %c0_i32_1 = arith.constant 0 : i32
    return %c0_i32, %c0_i32_0 : i32, i32
  }
  func.func @transform_4(%arg0: i32, %arg1: i32) -> (i32, i32) {
    %c0_i32 = arith.constant 0 : i32
    %c0_i32_0 = arith.constant 0 : i32
    %c0_i32_1 = arith.constant 0 : i32
    return %c0_i32, %c0_i32_0 : i32, i32
  }
  func.func @transform_5(%arg0: i32, %arg1: i32) -> (i32, i32) {
    %c0_i32 = arith.constant 0 : i32
    %c0_i32_0 = arith.constant 0 : i32
    %c0_i32_1 = arith.constant 0 : i32
    return %c0_i32, %c0_i32_0 : i32, i32
  }
  func.func @transform_6(%arg0: i32, %arg1: i32) -> (i32, i32) {
    %c0_i32 = arith.constant 0 : i32
    %c0_i32_0 = arith.constant 0 : i32
    %c0_i32_1 = arith.constant 0 : i32
    return %c0_i32, %c0_i32_0 : i32, i32
  }
  func.func @transform_7(%arg0: i32, %arg1: i32) -> (i32, i32) {
    %c0_i32 = arith.constant 0 : i32
    %c0_i32_0 = arith.constant 0 : i32
    %c0_i32_1 = arith.constant 0 : i32
    return %c0_i32, %c0_i32_0 : i32, i32
  }
  func.func @transform_8(%arg0: i32, %arg1: i32) -> (i32, i32, i32) {
    %c0_i32 = arith.constant 0 : i32
    %c0_i32_0 = arith.constant 0 : i32
    return %arg0, %arg1, %c0_i32 : i32, i32, i32
  }
}

</mosaic_0001>

<bundles_post_ra>
// kernel: tpu_custom_call.1
= control target key start
LH: loop header
LB: loop body
LE: loop exit
PB: predicated region body
PF: predicated region fallthrough
CT: control target
= control target key end

     0   :  { %s2140_s0 = inlined_call_operand.hbm [shape: bf16[2,8,32], index: 0, kind: input, shape index: {}]   ;;  %s2141_s1 = inlined_call_operand.hbm [shape: bf16[2,8,32], index: 1, kind: input, shape index: {}]   ;;  %s2142_s2 = inlined_call_operand.hbm [shape: bf16[32,32], index: 2, kind: input, shape index: {}]   ;;  %s2143_s3 = inlined_call_operand.vmem [shape: f32[1,32], index: 3, kind: input, shape index: {}]   ;;  %s2144_s4 = inlined_call_operand.hbm [shape: bf16[32,64], index: 4, kind: input, shape index: {}]   ;;  %s2145_s5 = inlined_call_operand.vmem [shape: f32[1,64], index: 5, kind: input, shape index: {}]   ;;  %s2146_s6 = inlined_call_operand.hbm [shape: bf16[32,128], index: 6, kind: input, shape index: {}]   ;;  %s2147_s7 = inlined_call_operand.vmem [shape: f32[1,128], index: 7, kind: input, shape index: {}]   ;;  %s2148_s8 = inlined_call_operand.hbm [shape: f32[2,8,128], index: 8, kind: output, shape index: {}]  }
   0x1   :  { %2153 = sst [smem:[#allocation21_spill]] %s2140_s0 }
   0x2   :  { %2154 = sst [smem:[#allocation22_spill]] %s2142_s2 }
   0x3   :  { %2155 = sst [smem:[#allocation23_spill]] %s2144_s4 }
   0x4   :  { %2156 = sst [smem:[#allocation24_spill]] %s2146_s6 }
   0x5   :  { %13 = vsyncpa [#allocation5], 0 }
   0x6   :  { %15 = vsyncpa [#allocation5 + $0x1], 0 }
   0x7   :  { %16 = vsyncpa [#allocation8], 0 }
   0x8   :  { %18 = vsyncpa [#allocation8 + $0x1], 0 }
   0x9   :  { %19 = vsyncpa [#allocation11], 0 }
   0xa   :  { %20 = vsyncpa [#allocation6], 0 }
   0xb   :  { %22 = vsyncpa [#allocation6 + $0x1], 0  ;;  %s1842_s27 = smov 0   ;;  %s1844_s28 = smov 0  }
   0xc   :  { %s1846_s29 = smov 0   ;;  %s1848_s30 = smov 0  }
   0xd   :  { %s1850_s9 = smov 0   ;;  %s1852_s10 = smov 0  }
   0xe LB: > { %s1873_s11 = sadd.s32 4294967295, %s1775_s10   ;;  %s1263_s12 = sadd.s32 4294967294, %s1775_s10   ;;  %s1775_s10 = sphi %s1852_s10, %s28_s10   ;;  %s1771_s9 = sphi %s1850_s9, %s2183_s9   ;;  %s1767_s30 = sphi %s1848_s30, %s2182_s30   ;;  %s1763_s29 = sphi %s1846_s29, %s2181_s29   ;;  %s1759_s28 = sphi %s1844_s28, %s2180_s28   ;;  %s1755_s27 = sphi %s1842_s27, %s2179_s27  }
   0xf   : > { %p62_p0 = scmp.ne.s32.totalorder %s1759_s28, %s1755_s27  ;;  %p2149_p1 = scmp.eq.s32.totalorder %s1873_s11, 0 }
  0x10   : > { %p246_p3 = scmp.eq.s32.totalorder %s1263_s12, 1  ;;  %p1264_p5 = scmp.ge.s32.totalorder %s1775_s10, 1 }
  0x11   : > { %p1882_p4 = por %p2149_p1, %p62_p0  ;;  %p253_p7 = scmp.lt.s32.totalorder %s1775_s10, 3 }
  0x12   : > { %p1887_p6 = por %p246_p3, %p62_p0  ;;  %s1777_s16 = smov [#allocation9]  }
  0x13   : > { %s2157_s13 = scalar_select %p1882_p4, 1, 0 }
  0x14   : > { %s2158_s14 = scalar_select %p1887_p6, 1, 0 }
  0x15   : > { %p1892_p8 = pnand %p1264_p5, %p253_p7  ;;  %s265_s17 = sshll.u32 %s1777_s16, 4  ;;  %s266_s17 = int_to_ptr.vmem [resolvable:$true] %s265_s17 }
  0x16   : > { %2159 = sst [smem:[#allocation19_spill]] %s2158_s14  ;;  %s1778_s19 = smov [#allocation10]  }
  0x17   : > { %p1429_p9 = pneg %p1892_p8  ;;  %s281_s20 = sshll.u32 %s1778_s19, 4  ;;  %s282_s20 = int_to_ptr.vmem [resolvable:$true] %s281_s20 }
  0x18   : > { %s1779_s21 = smov [#allocation12]   ;;  %s1560_s23 = scalar_lea.vmem %s266_s17, 256 }
  0x19   : > { %p1901_p11 = pnand %p1429_p9, %p2149_p1  ;;  %s297_s22 = sshll.u32 %s1779_s21, 4  ;;  %s298_s22 = int_to_ptr.vmem [resolvable:$true] %s297_s22 }
  0x1a   : > { %p1561_p13 = scmp.ne.s32.totalorder %s266_s17, %s1560_s23  ;;  %p1568_p5 = scmp.lt.s32.totalorder %s266_s17, %s266_s17 }
  0x1b   : > { %p1551_p12 = pneg %p1901_p11  ;;  %p1569_p7 = scmp.lt.s32.totalorder %s1560_s23, %s1560_s23 }
  0x1d   : > { %p1563_p0 = pnand %p1561_p13, %p1551_p12  ;;  %p1570_p9 = por %p1569_p7, %p1568_p5 }
  0x1f   : > { %p1564_p3 = pneg %p1563_p0 }
  0x21   : > { %p1571_p10 = pnand %p1570_p9, %p1564_p3 }
  0x23   : > { %1574 = shalt.err (!%p1571_p10)
}
  0x24   : > { %s1780_s24 = smov 64   ;;  %s1781_s25 = smov 4  }
  0x25   : > { %s2162_s2 = sld [smem:[#allocation22_spill]]  ;;  %s1586_s16 = scalar_lea.vmem %s282_s20, 256 }
  0x26   : > { %p1587_p1 = scmp.ne.s32.totalorder %s282_s20, %s1586_s16  ;;  %p1594_p2 = scmp.lt.s32.totalorder %s282_s20, %s282_s20 }
  0x27   : > { %p1595_p6 = scmp.lt.s32.totalorder %s1586_s16, %s1586_s16 }
  0x28   : > { %p1589_p13 = pnand %p1587_p1, %p1551_p12 }
  0x29   : > { %p1596_p5 = por %p1595_p6, %p1594_p2 }
  0x2a   : > { %p1590_p0 = pneg %p1589_p13 }
  0x2b   : > { %1432 = dma.hbm_to_vmem [thread:$0]  (!%p1901_p11), %s2162_s2, 256, %s266_s17, [#allocation8], %s1780_s24, %s1780_s24, %s1781_s25  }
  0x2c   : > { %p1597_p3 = pnand %p1596_p5, %p1590_p0 }
  0x2e   : > { %1600 = shalt.err (!%p1597_p3)
}
  0x2f   : > { %s2163_s4 = sld [smem:[#allocation23_spill]]  ;;  %s1612_s17 = scalar_lea.vmem %s298_s22, 256 }
  0x30   : > { %p1613_p10 = scmp.ne.s32.totalorder %s298_s22, %s1612_s17  ;;  %p1620_p9 = scmp.lt.s32.totalorder %s298_s22, %s298_s22 }
  0x31   : > { %p1621_p13 = scmp.lt.s32.totalorder %s1612_s17, %s1612_s17 }
  0x32   : > { %p1615_p7 = pnand %p1613_p10, %p1551_p12 }
  0x33   : > { %p1622_p4 = por %p1621_p13, %p1620_p9 }
  0x34   : > { %p1616_p1 = pneg %p1615_p7 }
  0x35   : > { %1435 = dma.hbm_to_vmem [thread:$0]  (!%p1901_p11), %s2163_s4, 256, %s282_s20, [#allocation11], %s1780_s24, %s1780_s24, %s1781_s25  }
  0x36   : > { %p1623_p2 = pnand %p1622_p4, %p1616_p1 }
  0x38   : > { %1626 = shalt.err (!%p1623_p2)
}
  0x39   : > { %s2164_s6 = sld [smem:[#allocation24_spill]]  ;;  %s49_s20 = sadd.s32 1, %s1763_s29 }
  0x3a   : > { %s40_s12 = sadd.s32 1, %s1771_s9  ;;  %p56_p4 = scmp.ne.s32.totalorder %s1763_s29, %s1759_s28 }
  0x3b   : > { %p42_p6 = scmp.ge.s32.totalorder %s40_s12, 2  ;;  %p57_p12 = scmp.eq.s32.totalorder %s1775_s10, 0 }
  0x3c   : > { %p2165_p0 = scmp.eq.s32.totalorder %s1873_s11, 1  ;;  %p1453_p3 = scmp.lt.s32.totalorder %s1775_s10, 2 }
  0x3d   : > { %s2185_s12 = smov (%p42_p6, %s40_s12), 0  ;;  %p58_p10 = por %p57_p12, %p56_p4 }
  0x3e   : > { %p1938_p5 = por %p2165_p0, %p56_p4  ;;  %2167 = sst [smem:[#allocation20_spill]] %s2185_s12 }
  0x3f   : > { %1438 = dma.hbm_to_vmem [thread:$0]  (!%p1901_p11), %s2164_s6, 256, %s298_s22, [#allocation11], %s1780_s24, %s1780_s24, %s1781_s25  }
  0x40   : > { %s314_s16 = sand.u32 1, %s1763_s29   ;;  %s44_s19 = ssub.s32 %s1771_s9, %s2185_s12 }
  0x41   : > { %p47_p11 = scmp.eq.s32.totalorder %s44_s19, 0  ;;  %s1269_s22 = sshll.u32 %s314_s16, 2 }
  0x42   : > { %s1270_s24 = sshll.u32 %s1771_s9, 6  ;;  %s2168_s0 = sld [smem:[#allocation21_spill]] }
  0x43   : > { %s1950_s25 = scalar_select %p47_p11, %s1763_s29, %s49_s20  }
  0x44   : > { %s318_s26 = scalar_lea.vmem [#allocation4], %s1269_s22  ;;  %p1957_p7 = pnand %p1453_p3, %p58_p10 }
  0x45   : > { %s326_s2 = sshll.u32 %s318_s26, 4  ;;  %s1964_s19 = scalar_lea.hbm %s2141_s1, %s1270_s24  ;;  %s327_s2 = int_to_ptr.vmem [resolvable:$true] %s326_s2 }
  0x46   : > { %s333_s20 = sand.u32 1, %s1775_s10   ;;  %s315_s12 = scalar_lea.sflag [#allocation5], %s314_s16 }
  0x47   : > { %p1629_p1 = pneg %p1957_p7  ;;  %s1640_s21 = scalar_lea.vmem %s327_s2, 64 }
  0x48   : > { %s324_s23 = scalar_lea.hbm %s2168_s0, %s1270_s24  ;;  %p1641_p9 = scmp.ne.s32.totalorder %s327_s2, %s1640_s21 }
  0x49   : > { %s1782_s17 = smov [#allocation4]  }
  0x4a   : > { %p1643_p13 = pnand %p1641_p9, %p1629_p1  ;;  %s1645_s26 = sshll.u32 %s1782_s17, 4  ;;  %s1646_s26 = int_to_ptr.vmem [resolvable:$false] %s1645_s26 }
  0x4b   : > { %s1647_s0 = scalar_lea.vmem %s1646_s26, 128  ;;  %p1648_p4 = scmp.lt.s32.totalorder %s327_s2, %s1646_s26 }
  0x4c   : > { %p1644_p2 = pneg %p1643_p13  ;;  %p1649_p6 = scmp.lt.s32.totalorder %s1647_s0, %s1640_s21 }
  0x4e   : > { %p1650_p12 = por %p1649_p6, %p1648_p4 }
  0x50   : > { %p1651_p0 = pnand %p1650_p12, %p1644_p2 }
  0x52   : > { %1654 = shalt.err (!%p1651_p0)
}
  0x53   : > { %1442 = dma.hbm_to_vmem [thread:$0]  (!%p1957_p7), %s324_s23, 64, %s327_s2, %s315_s12  }
  0x54   : > { %s337_s6 = scalar_lea.vmem [#allocation7], %s1269_s22  ;;  %s334_s16 = scalar_lea.sflag [#allocation8], %s333_s20 }
  0x55   : > { %s344_s14 = sshll.u32 %s337_s6, 4  ;;  %s1783_s17 = smov [#allocation7]   ;;  %s345_s14 = int_to_ptr.vmem [resolvable:$true] %s344_s14 }
  0x56   : > { %s1668_s24 = scalar_lea.vmem %s345_s14, 64  ;;  %s1673_s26 = sshll.u32 %s1783_s17, 4  ;;  %s1674_s26 = int_to_ptr.vmem [resolvable:$false] %s1673_s26 }
  0x57   : > { %p1669_p3 = scmp.ne.s32.totalorder %s345_s14, %s1668_s24  ;;  %s1675_s0 = scalar_lea.vmem %s1674_s26, 128 }
  0x58   : > { %p1676_p9 = scmp.lt.s32.totalorder %s345_s14, %s1674_s26  ;;  %p1677_p13 = scmp.lt.s32.totalorder %s1675_s0, %s1668_s24 }
  0x59   : > { %p1671_p10 = pnand %p1669_p3, %p1629_p1 }
  0x5a   : > { %p1678_p2 = por %p1677_p13, %p1676_p9 }
  0x5b   : > { %p1672_p11 = pneg %p1671_p10 }
  0x5d   : > { %p1679_p4 = pnand %p1678_p2, %p1672_p11 }
  0x5f   : > { %1682 = shalt.err (!%p1679_p4)
}
  0x60   : > { %1445 = dma.hbm_to_vmem [thread:$0]  (!%p1957_p7), %s1964_s19, 64, %s345_s14, %s334_s16  }
  0x61   : > { %353 = sbr.rel (%p1892_p8) target bundleno = 1354 (0x54a), region = 52  ;;  %s1983_s2 = sand.u32 (!%p1892_p8), 1, %s1759_s28  }
  0x62   : > { %s1274_s12 = sshll.u32 (!%p1892_p8), %s1983_s2, 2  ;;  %s356_s22 = scalar_lea.sflag (!%p1892_p8), [#allocation5], %s1983_s2 }
  0x63   : > { %s1987_s23 = scalar_lea.vmem (!%p1892_p8), [#allocation4], %s1274_s12  ;;  %p2170_p1 = scmp.ne.s32.totalorder (!%p1892_p8), %s2157_s13, 0 }
  0x66   : > { %1734 = dma.done.wait (%p2170_p1), %s356_s22, 64  }
  0x67   : > { %1736 = vsyncadd (%p2170_p1), %s356_s22, 4294967232  ;;  %s364_s4 = sand.u32 1, %s1873_s11   ;;  %s368_s19 = scalar_lea.vmem [#allocation7], %s1274_s12 }
  0x68   : > { %s365_s15 = scalar_lea.sflag [#allocation8], %s364_s4 }
  0x69   : > { %1738 = dma.done.wait (%p2170_p1), %s365_s15, 64  }
  0x6a   : > { %1740 = vsyncadd (%p2170_p1), %s365_s15, 4294967232  ;;  %p2171_p8 = scmp.eq.s32.totalorder %s1873_s11, 0 }
  0x6c   : > { %1742 = dma.done.wait (%p2171_p8), [#allocation8], 256   ;;  %p2172_p7 = pmov %p2171_p8 }
  0x6e   : > { %1744 = vsyncadd (%p2172_p7), [#allocation8], 4294967040  ;;  %p2173_p6 = pmov %p2172_p7 }
  0x70   : > { %1746 = dma.done.wait (%p2173_p6), [#allocation11], 512   ;;  %p2174_p12 = pmov %p2173_p6 }
  0x71   : > { %v1784_v0 = vmov 0.0   ;;  %vm1785_vm0 = vmmov 0   ;;  %v1523_v1 = vld [vmem:[#allocation10 + $0x8] sm:$0xff]   ;;  %v1524_v2 = vld [vmem:[#allocation10] sm:$0xff]   ;;  %v1525_v3 = vld [vmem:[#allocation9 + $0x8] sm:$0xff]   ;;  %vm447_vm1 = vcmask 261120  }
  0x72   : > { %1748 = vsyncadd (%p2174_p12), [#allocation11], 4294966784  ;;  %1339 = vmatprep.subr.bf16.mxu0 %v1784_v0  ;;  %1343 = vmatprep.mubr.msk.bf16.mxu0 %vm1785_vm0, %v1784_v0  ;;  %v1526_v4 = vld [vmem:[#allocation9] sm:$0xff]   ;;  %v423_v5 = vld [vmem:[%s368_s19] sm:$0xf]  ;;  %vm492_vm2 = vcmask 519168  }
  0x73   : > { %1347 = vmatprep.subr.bf16.mxu1 %v1784_v0  ;;  %1351 = vmatprep.mubr.msk.bf16.mxu1 %vm1785_vm0, %v1784_v0  ;;  %v494_v6 = vld [vmem:[%s1987_s23] sm:$0xf]  ;;  %v1280_v7 = vld [vmem:[%s2145_s5] ss:$0 sm:$0xff]  ;;  %vm564_vm3 = vcmask 64512   ;;  %s1786_s6 = smov 112  }
  0x74   : > { %1340 = vmatpush3.bf16.msra.mxu0 %v1523_v1  ;;  %1348 = vmatpush3.bf16.msra.mxu1 %v1525_v3  ;;  %v1284_v16 = vld [vmem:[%s2143_s3] ss:$0 sm:$0xff]  ;;  %s1787_s14 = smov 120   ;;  %s1788_s16 = smov 104   ;;  %vm629_vm4 = vcmask 1043456   ;;  %vm676_vm5 = vcmask 60416  }
  0x75   : > { %1341 = vmatprep.subr.bf16.mxu0 %v1784_v0  ;;  %1349 = vmatprep.subr.bf16.mxu1 %v1784_v0  ;;  %s1789_s24 = smov 96   ;;  %s1790_s17 = smov 80   ;;  %vm800_vm6 = vcmask 126016   ;;  %vm923_vm7 = vcmask 191616   ;;  %vm1046_vm8 = vcmask 257216  }
  0x76   : > { %s1791_s26 = smov 72   ;;  %s1792_s0 = smov 88  }
  0x77   : > { %s1793_s12 = smov 8   ;;  %s1794_s22 = smov 16  }
  0x78   : > { %1342 = vmatpush3.bf16.msra.mxu0 %v1524_v2  ;;  %1350 = vmatpush3.bf16.msra.mxu1 %v1526_v4  ;;  %s1795_s23 = smov 24   ;;  %s1279_s4 = sshll.u32 %s1983_s2, 3 }
  0x79   : > { %1355 = vmatprep.subr.bf16.mxu0 %v1784_v0  ;;  %1361 = vmatprep.subr.bf16.mxu1 %v1784_v0  ;;  %s1308_s11 = sshll.u32 %s1767_s30, 7  ;;  %s417_s13 = scalar_lea.vmem [#allocation13], %s1279_s4 }
  0x7a   : > { %s1131_s20 = sshll.u32 %s417_s13, 4  ;;  %s1796_s30 = smov [#allocation13]   ;;  %s2094_s20 = int_to_ptr.vmem [resolvable:$true] %s1131_s20 }
  0x7b   : > { %1344 = vmatmul.mubr.msk.bf16.vlgmr.msra.gmra.mxu0 %vm447_vm1, %v423_v5  ;;  %1352 = vmatmul.mubr.msk.bf16.vlgmr.msra.gmra.mxu1 %vm447_vm1, %v494_v6 }
  0x7c   : > { %1357 = vmatprep.mubr.msk.bf16.mxu0 %vm1785_vm0, %v1784_v0  ;;  %1363 = vmatprep.mubr.msk.bf16.mxu1 %vm1785_vm0, %v1784_v0 }
 0x13b   : > { %v485_v8 = vpop.f32.mrf.mxu0  ;;  %v556_v12 = vpop.f32.mrf.mxu1 }
 0x13c   : > { %v486_v9 = vadd.f32 %v1280_v7, %v485_v8  ;;  %v557_v19 = vadd.f32 %v1284_v16, %v556_v12 }
 0x13d   : > { %v1345_v10 = vpop.f32.mrf.mxu0  ;;  %v1353_v14 = vpop.f32.mrf.mxu1 }
 0x13e   : > { %v491_v11 = vpack.c.bf16 %v486_v9, %v486_v9  ;;  %v562_v24 = vpack.c.bf16 %v557_v19, %v557_v19 }
 0x13f   : > { %v488_v13 = vpop.f32.mrf.mxu0  ;;  %v559_v17 = vpop.f32.mrf.mxu1 }
 0x140   : > { %493 = vst.msk [vmem:[#allocation2] sm:$0xf] %vm492_vm2, %v491_v11 }
 0x141   : > { %v1346_v15 = vpop.f32.mrf.mxu0  ;;  %v1354_v18 = vpop.f32.mrf.mxu1 }
 0x147   : > { %v563_v20 = vld [vmem:[#allocation2] sm:$0xf] }
 0x148   : > { %v2029_v21 = vld [vmem:[#allocation2] ss:$0 sps:$4 sm:$0xff]   ;;  %v569_v22 = vsel %vm564_vm3, %v563_v20, 0  ;;  %v1289_v26 = vcombine.low %v563_v20, %v563_v20 }
 0x149   : > { %v2032_v23 = vld [vmem:[#allocation2] ss:$0 sps:$4 sm:$0xff]   ;;  %1356 = vmatpush3.bf16.xpose.msra.mxu0 %v569_v22  ;;  %808 = vrot.lane.b32.xlu1 %v2029_v21, %s1786_s6 }
 0x14a   : > { %685 = vrot.lane.b32.xlu0 %v2032_v23, %s1787_s14  ;;  %1367 = vmatprep.subr.bf16.mxu0 %v1784_v0  ;;  %v1529_v25 = vld [vmem:[#allocation2] ss:$0 sps:$4 sm:$0xff]  }
 0x14d   : > { %803 = vrot.lane.b32.xlu1 %v562_v24, %s1786_s6 }
 0x14e   : > { %680 = vrot.lane.b32.xlu0 %v562_v24, %s1787_s14  ;;  %s2092_s14 = scalar_lea.hbm %s2148_s8, %s1308_s11 }
 0x150   : > { %1358 = vmatmul.mubr.msk.bf16.vlgmr.msra.gmra.mxu0 %vm564_vm3, %v562_v24 }
 0x151   : > { %926 = vrot.lane.b32.xlu1 %v562_v24, %s1788_s16  ;;  %1369 = vmatprep.mubr.msk.bf16.mxu0 %vm1785_vm0, %v1784_v0 }
 0x152   : > { %931 = vrot.lane.b32.xlu0 %v1529_v25, %s1788_s16  ;;  %s1117_s16 = scalar_lea.sflag [#allocation6], %s1983_s2 }
 0x155   : > { %624 = vrot.lane.b32.xlu1 %v1289_v26, %s1789_s24  ;;  %s1683_s24 = scalar_lea.vmem %s2094_s20, 128 }
 0x156   : > { %p1684_p0 = scmp.ne.s32.totalorder %s2094_s20, %s1683_s24 }
 0x158   : > { %p1685_p3 = pnand %p1684_p0, %p1938_p5 }
 0x15a   : > { %p1686_p10 = pneg %p1685_p3 }
 0x1bb   : > { %v809_v27 = vpop.permute.xlu1 %808 }
 0x1bc   : > { %v686_v28 = vpop.permute.xlu0 %685  ;;  %v814_v33 = vsel %vm564_vm3, %v809_v27, 0 }
 0x1bd   : > { %v691_v29 = vsel %vm564_vm3, %v686_v28, 0 }
 0x1be   : > { %1368 = vmatpush3.bf16.xpose.msra.mxu0 %v691_v29 }
 0x1bf   : > { %v804_v30 = vpop.permute.xlu1 %803  ;;  %1379 = vmatprep.subr.bf16.mxu0 %v1784_v0 }
 0x1c0   : > { %v681_v32 = vpop.permute.xlu0 %680 }
 0x1c3   : > { %v927_v31 = vpop.permute.xlu1 %926 }
 0x1c4   : > { %v932_v36 = vpop.permute.xlu0 %931 }
 0x1c5   : > { %1370 = vmatmul.mubr.msk.bf16.vlgmr.msra.gmra.mxu0 %vm564_vm3, %v681_v32  ;;  %v937_v37 = vsel %vm564_vm3, %v932_v36, 0 }
 0x1c6   : > { %1380 = vmatpush3.bf16.xpose.msra.mxu0 %v814_v33  ;;  %1381 = vmatprep.mubr.msk.bf16.mxu0 %vm1785_vm0, %v1784_v0 }
 0x1c7   : > { %v625_v34 = vpop.permute.xlu1 %624  ;;  %1391 = vmatprep.subr.bf16.mxu0 %v1784_v0 }
 0x1c8   : > { %v631_v35 = vsel %vm629_vm4, %v625_v34, 0 }
 0x1c9   : > { %1362 = vmatpush3.bf16.msra.mxu1 %v631_v35 }
 0x1ca   : > { %1373 = vmatprep.subr.bf16.mxu1 %v1784_v0 }
 0x1cd   : > { %1382 = vmatmul.mubr.msk.bf16.vlgmr.msra.gmra.mxu0 %vm564_vm3, %v804_v30 }
 0x1ce   : > { %1392 = vmatpush3.bf16.xpose.msra.mxu0 %v937_v37  ;;  %1393 = vmatprep.mubr.msk.bf16.mxu0 %vm1785_vm0, %v1784_v0 }
 0x1cf   : > { %1403 = vmatprep.subr.bf16.mxu0 %v1784_v0 }
 0x1d5   : > { %1394 = vmatmul.mubr.msk.bf16.vlgmr.msra.gmra.mxu0 %vm564_vm3, %v927_v31 }
 0x1d6   : > { %1407 = vmatprep.mubr.msk.bf16.mxu0 %vm1785_vm0, %v1784_v0 }
 0x210   : > { %v605_v38 = vpop.f32.mrf.mxu0 }
 0x211   : > { %v611_v39 = vsel %vm564_vm3, %v605_v38, -inf }
 0x212   : > { %612 = vmax.xlane.f32.xlu0 %v611_v39  ;;  %v1359_v40 = vpop.f32.mrf.mxu0 }
 0x214   : > { %v608_v41 = vpop.f32.mrf.mxu0 }
 0x216   : > { %v1360_v42 = vpop.f32.mrf.mxu0 }
 0x285   : > { %v727_v43 = vpop.f32.mrf.mxu0 }
 0x286   : > { %v733_v44 = vsel %vm564_vm3, %v727_v43, -inf }
 0x287   : > { %734 = vmax.xlane.f32.xlu1 %v733_v44  ;;  %v1371_v45 = vpop.f32.mrf.mxu0 }
 0x288   : > { %v1531_v45 = vld [vmem:[#allocation12 + $0x8] sm:$0xff]  }
 0x289   : > { %v730_v46 = vpop.f32.mrf.mxu0  ;;  %1404 = vmatpush3.bf16.msra.mxu0 %v1531_v45 }
 0x28a   : > { %1405 = vmatprep.subr.bf16.mxu0 %v1784_v0 }
 0x28b   : > { %v1372_v47 = vpop.f32.mrf.mxu0 }
 0x28d   : > { %v850_v48 = vpop.f32.mrf.mxu0 }
 0x28e   : > { %v856_v49 = vsel %vm564_vm3, %v850_v48, -inf }
 0x28f   : > { %857 = vmax.xlane.f32.xlu0 %v856_v49  ;;  %v1383_v50 = vpop.f32.mrf.mxu0 }
 0x291   : > { %v853_v51 = vpop.f32.mrf.mxu0 }
 0x293   : > { %v1384_v52 = vpop.f32.mrf.mxu0 }
 0x295   : > { %v973_v53 = vpop.f32.mrf.mxu0 }
 0x296   : > { %v979_v54 = vsel %vm564_vm3, %v973_v53, -inf }
 0x297   : > { %980 = vmax.xlane.f32.xlu0 %v979_v54  ;;  %v1395_v55 = vpop.f32.mrf.mxu0 }
 0x298   : > { %866 = vrot.lane.b32.xlu1 %v2029_v21, %s1790_s17  ;;  %s1687_s17 = sshll.u32 %s1796_s30, 4  ;;  %s1688_s17 = int_to_ptr.vmem [resolvable:$false] %s1687_s17 }
 0x299   : > { %v976_v56 = vpop.f32.mrf.mxu0  ;;  %p1690_p11 = scmp.lt.s32.totalorder %s2094_s20, %s1688_s17 }
 0x29b   : > { %v613_v57 = vpop.xlane.xlu0 %612  ;;  %v1396_v58 = vpop.f32.mrf.mxu0 }
 0x29c   : > { %v614_v59 = vsub.f32 %v605_v38, %v613_v57  ;;  %989 = vrot.lane.b32.xlu1 %v1529_v25, %s1791_s26  ;;  %s1689_s26 = scalar_lea.vmem %s1688_s17, 256 }
 0x29d   : > { %p1691_p9 = scmp.lt.s32.totalorder %s1689_s26, %s1683_s24 }
 0x29e   : > { %v615_v60 = vmul.f32 1.442695, %v614_v59 }
 0x29f   : > { %p1692_p13 = por %p1691_p9, %p1690_p11 }
 0x2a0   : > { %1533 = vpow2.f32 %v615_v60 }
 0x2a1   : > { %p1693_p2 = pnand %p1692_p13, %p1686_p10 }
 0x2ad   : > { %v1534_v61 = vpop.eup %1533  ;;  %743 = vrot.lane.b32.xlu0 %v2032_v23, %s1792_s0 }
 0x2ae   : > { %v620_v62 = vpack.c.bf16 %v1534_v61, %v1534_v61  ;;  %v617_v23 = vsel %vm564_vm3, %v1534_v61, 0.0 }
 0x2b0   : > { %1364 = vmatmul.mubr.msk.bf16.vlgmr.msra.gmra.mxu1 %vm564_vm3, %v620_v62  ;;  %v1303_v62 = vld [vmem:[%s2147_s7] ss:$0 sm:$0xff] }
 0x2b1   : > { %1375 = vmatprep.mubr.msk.bf16.mxu1 %vm1785_vm0, %v1784_v0 }
 0x310   : > { %v735_v63 = vpop.xlane.xlu1 %734 }
 0x311   : > { %v736_v1 = vsub.f32 %v727_v43, %v735_v63 }
 0x313   : > { %v737_v2 = vmul.f32 1.442695, %v736_v1 }
 0x314   : > { %v867_v13 = vpop.permute.xlu1 %866 }
 0x315   : > { %1535 = vpow2.f32 %v737_v2  ;;  %v872_v15 = vsel %vm629_vm4, %v867_v13, 0 }
 0x318   : > { %v858_v3 = vpop.xlane.xlu0 %857  ;;  %v990_v18 = vpop.permute.xlu1 %989 }
 0x319   : > { %v859_v4 = vsub.f32 %v850_v48, %v858_v3  ;;  %v995_v20 = vsel %vm629_vm4, %v990_v18, 0  ;;  %v1532_v48 = vld [vmem:[#allocation12] sm:$0xff]  }
 0x31a   : > { %1406 = vmatpush3.bf16.msra.mxu0 %v1532_v48 }
 0x31b   : > { %v860_v5 = vmul.f32 1.442695, %v859_v4 }
 0x31d   : > { %1537 = vpow2.f32 %v860_v5 }
 0x320   : > { %v981_v6 = vpop.xlane.xlu0 %980 }
 0x321   : > { %v982_v7 = vsub.f32 %v973_v53, %v981_v6 }
 0x322   : > { %v1536_v8 = vpop.eup %1535 }
 0x323   : > { %v983_v9 = vmul.f32 1.442695, %v982_v7  ;;  %v739_v10 = vsel %vm564_vm3, %v1536_v8, 0.0  ;;  %v742_v14 = vpack.c.bf16 %v1536_v8, %v1536_v8 }
 0x324   : > { %740 = vadd.xlane.f32.xlu0 %v739_v10  ;;  %v744_v11 = vpop.permute.xlu0 %743 }
 0x325   : > { %1539 = vpow2.f32 %v983_v9  ;;  %v749_v12 = vsel %vm629_vm4, %v744_v11, 0 }
 0x326   : > { %1374 = vmatpush3.bf16.msra.mxu1 %v749_v12 }
 0x327   : > { %1385 = vmatprep.subr.bf16.mxu1 %v1784_v0 }
 0x329   : > { %1376 = vmatmul.mubr.msk.bf16.vlgmr.msra.gmra.mxu1 %vm564_vm3, %v742_v14 }
 0x32a   : > { %v1538_v16 = vpop.eup %1537  ;;  %1386 = vmatpush3.bf16.msra.mxu1 %v872_v15  ;;  %1387 = vmatprep.mubr.msk.bf16.mxu1 %vm1785_vm0, %v1784_v0 }
 0x32b   : > { %v862_v17 = vsel %vm564_vm3, %v1538_v16, 0.0  ;;  %1397 = vmatprep.subr.bf16.mxu1 %v1784_v0  ;;  %v865_v19 = vpack.c.bf16 %v1538_v16, %v1538_v16 }
 0x32c   : > { %863 = vadd.xlane.f32.xlu1 %v862_v17 }
 0x331   : > { %1388 = vmatmul.mubr.msk.bf16.vlgmr.msra.gmra.mxu1 %vm564_vm3, %v865_v19 }
 0x332   : > { %v1540_v21 = vpop.eup %1539  ;;  %1398 = vmatpush3.bf16.msra.mxu1 %v995_v20  ;;  %1399 = vmatprep.mubr.msk.bf16.mxu1 %vm1785_vm0, %v1784_v0 }
 0x333   : > { %v985_v22 = vsel %vm564_vm3, %v1540_v21, 0.0  ;;  %v988_v24 = vpack.c.bf16 %v1540_v21, %v1540_v21 }
 0x334   : > { %986 = vadd.xlane.f32.xlu0 %v985_v22 }
 0x338   : > { %618 = vadd.xlane.f32.xlu0 %v617_v23 }
 0x339   : > { %1400 = vmatmul.mubr.msk.bf16.vlgmr.msra.gmra.mxu1 %vm564_vm3, %v988_v24 }
 0x370   : > { %v667_v25 = vpop.f32.mrf.mxu1 }
 0x372   : > { %v1365_v26 = vpop.f32.mrf.mxu1 }
 0x374   : > { %v670_v27 = vpop.f32.mrf.mxu1 }
 0x376   : > { %v1366_v28 = vpop.f32.mrf.mxu1 }
 0x3ad   : > { %v741_v29 = vpop.xlane.xlu0 %740 }
 0x3b5   : > { %v864_v35 = vpop.xlane.xlu1 %863 }
 0x3bd   : > { %v987_v30 = vpop.xlane.xlu0 %986 }
 0x3c1   : > { %v619_v31 = vpop.xlane.xlu0 %618 }
 0x3c2   : > { %1541 = vrcp.f32 %v619_v31 }
 0x3c3   : > { %1543 = vrcp.f32 %v741_v29 }
 0x3c4   : > { %1545 = vrcp.f32 %v864_v35 }
 0x3c5   : > { %1547 = vrcp.f32 %v987_v30 }
 0x3cf   : > { %v1542_v32 = vpop.eup %1541 }
 0x3d0   : > { %v674_v33 = vmul.f32 %v1542_v32, %v667_v25  ;;  %v1544_v36 = vpop.eup %1543 }
 0x3d1   : > { %v1546_v43 = vpop.eup %1545 }
 0x3d2   : > { %v675_v34 = vpack.c.bf16 %v674_v33, %v674_v33  ;;  %v1548_v52 = vpop.eup %1547 }
 0x3d4   : > { %677 = vst.msk [vmem:[#allocation3] sm:$0xf] %vm676_vm5, %v675_v34 }
 0x3e9   : > { %v785_v37 = vpop.f32.mrf.mxu1 }
 0x3ea   : > { %v792_v38 = vmul.f32 %v1544_v36, %v785_v37 }
 0x3eb   : > { %v1377_v39 = vpop.f32.mrf.mxu1 }
 0x3ec   : > { %v1311_v40 = vpack.c.bf16 %v792_v38, %v792_v38 }
 0x3ed   : > { %v788_v41 = vpop.f32.mrf.mxu1 }
 0x3ee   : > { %797 = vrot.lane.b32.xlu1 %v1311_v40, %s1793_s12 }
 0x3ef   : > { %v1378_v42 = vpop.f32.mrf.mxu1 }
 0x3f1   : > { %v908_v44 = vpop.f32.mrf.mxu1 }
 0x3f2   : > { %v915_v46 = vmul.f32 %v1546_v43, %v908_v44 }
 0x3f3   : > { %v1389_v47 = vpop.f32.mrf.mxu1 }
 0x3f4   : > { %v1312_v49 = vpack.c.bf16 %v915_v46, %v915_v46 }
 0x3f5   : > { %v911_v50 = vpop.f32.mrf.mxu1 }
 0x3f6   : > { %920 = vrot.lane.b32.xlu0 %v1312_v49, %s1794_s22 }
 0x3f7   : > { %v1390_v51 = vpop.f32.mrf.mxu1 }
 0x3f9   : > { %v1031_v53 = vpop.f32.mrf.mxu1 }
 0x3fa   : > { %v1038_v54 = vmul.f32 %v1548_v52, %v1031_v53 }
 0x3fb   : > { %v1401_v55 = vpop.f32.mrf.mxu1 }
 0x3fc   : > { %v1313_v56 = vpack.c.bf16 %v1038_v54, %v1038_v54 }
 0x3fd   : > { %v1034_v57 = vpop.f32.mrf.mxu1 }
 0x3fe   : > { %1043 = vrot.lane.b32.xlu1 %v1313_v56, %s1795_s23 }
 0x3ff   : > { %v1402_v58 = vpop.f32.mrf.mxu1 }
 0x460   : > { %v798_v59 = vpop.permute.xlu1 %797 }
 0x461   : > { %801 = vst.msk [vmem:[#allocation3] sm:$0xf] %vm800_vm6, %v798_v59 }
 0x468   : > { %v921_v0 = vpop.permute.xlu0 %920 }
 0x469   : > { %924 = vst.msk [vmem:[#allocation3] sm:$0xf] %vm923_vm7, %v921_v0 }
 0x470   : > { %v1044_v60 = vpop.permute.xlu1 %1043 }
 0x471   : > { %1047 = vst.msk [vmem:[#allocation3] sm:$0xf] %vm1046_vm8, %v1044_v60 }
 0x478   : > { %v1048_v61 = vld [vmem:[#allocation3] sm:$0xf] }
 0x479   : > { %1408 = vmatmul.mubr.msk.bf16.vlgmr.msra.gmra.mxu0 %vm447_vm1, %v1048_v61 }
 0x539   : > { %v1109_v63 = vpop.f32.mrf.mxu0 }
 0x53a   : > { %v1110_v1 = vadd.f32 %v1303_v62, %v1109_v63 }
 0x53b   : > { %v1409_v2 = vpop.f32.mrf.mxu0 }
 0x53c   : > { %1115 = vst [vmem:[%s417_s13] sm:$0xff] %v1110_v1 }
 0x53d   : > { %v1112_v3 = vpop.f32.mrf.mxu0 }
 0x53e   : > { %1696 = shalt.err (!%p1693_p2)
}
 0x53f   : > { %s1697_s0 = scalar_lea.hbm %s2092_s14, 128  ;;  %s1701_s22 = scalar_lea.hbm %s2148_s8, 256 }
 0x540   : > { %p1698_p4 = scmp.ne.s32.totalorder %s2092_s14, %s1697_s0  ;;  %p1702_p7 = scmp.lt.s32.totalorder %s2092_s14, %s2148_s8 }
 0x541   : > { %p1703_p6 = scmp.lt.s32.totalorder %s1701_s22, %s1697_s0 }
 0x542   : > { %p1699_p1 = pnand %p1698_p4, %p1938_p5 }
 0x543   : > { %p1704_p12 = por %p1703_p6, %p1702_p7 }
 0x544   : > { %p1700_p8 = pneg %p1699_p1 }
 0x546   : > { %p1705_p0 = pnand %p1704_p12, %p1700_p8 }
 0x548   : > { %1708 = shalt.err (!%p1705_p0)
}
 0x549   : > { %1427 = dma.vmem_to_hbm [thread:$0]  (%p1938_p5), %s2094_s20, 128, %s2092_s14, %s1117_s16   ;;  %v1410_v4 = vpop.f32.mrf.mxu0 }
 0x54a PF: > { %s2175_s15 = sld [smem:[#allocation19_spill]]  ;;  %s1143_s19 = sand.u32 1, %s1755_s27  }
 0x54b   : > { %p2177_p10 = scmp.ge.s32.totalorder %s1775_s10, 2  ;;  %s1144_s11 = scalar_lea.sflag [#allocation6], %s1143_s19 }
 0x550   : > { %p2176_p3 = scmp.ne.s32.totalorder %s2175_s15, 0 }
 0x552   : > { %p1447_p11 = pnand %p2177_p10, %p2176_p3 }
 0x554   : > { %p1448_p9 = pneg %p1447_p11 }
 0x556   : > { %1750 = dma.done.wait (%p1448_p9), %s1144_s11, 128  }
 0x557   : > { %1752 = vsyncadd (%p1448_p9), %s1144_s11, 4294967168  ;;  %s28_s10 = sadd.s32 1, %s1775_s10   ;;  %s2178_s18 = sld [smem:[#allocation20_spill]] }
 0x558   : > { %p25_p13 = scmp.ge.s32.totalorder %s28_s10, 4   ;;  %s2179_s27 = smov %s1759_s28 }
 0x559   : > { %s2180_s28 = smov %s1763_s29  ;;  %s2181_s29 = smov %s1950_s25 }
 0x55a   : > { %s2182_s30 = smov %s1771_s9  ;;  %27 = sbr.rel (!%p25_p13) target bundleno = 14 (0xe), region = 126 }
 0x55d   : > { %s2183_s9 = smov %s2178_s18 }
 0x55f   :  { %1149 = vsyncpa [#allocation5], 1 }
 0x560   :  { %1151 = vsyncpa [#allocation5 + $0x1], 1 }
 0x561   :  { %1152 = vsyncpa [#allocation8], 1 }
 0x562   :  { %1154 = vsyncpa [#allocation8 + $0x1], 1 }
 0x563   :  { %1155 = vsyncpa [#allocation11], 1 }
 0x564   :  { %1156 = vsyncpa [#allocation6], 1 }
 0x565   :  { %1158 = vsyncpa [#allocation6 + $0x1], 1 }

</bundles_post_ra>
